<compile_context>
chip_gen: v6e
topology: v6e:2x2x1
jax: 0.10.0
libtpu: 0.0.40
codegen_flags: <defaults>
</compile_context>

<pallas_src>
import jax
import jax.numpy as jnp
from jax.experimental import pallas as pl
from jax.experimental.pallas import tpu as pltpu

VOCAB = 64
HIDDEN = 32
LANE = 128


# ----------------------------- fused Pallas kernel ---------------------------

def _fused_encdec_kernel(lens_ref,        # (B,)  int32  SMEM (scalar prefetch)
                         src_tok_ref,     # (S,1) int32  source tokens, batch b
                         dec_tok_ref,     # (T,1) int32  prev output tokens, batch b
                         enc_proj_ref,    # (V,H) bf16   enc_embed @ w_enc (pre-folded)
                         w_out_ref,       # (H,Vp) bf16  vocab projection (padded)
                         dec_tab_ref,     # (V,Vp) bf16  dec_embed @ w_out_p (pre-folded)
                         b_enc_ref,       # (1,H)  f32
                         b_out_ref,       # (1,Vp) f32
                         out_ref):        # (T,Vp) f32   logits rows of batch b
    b = pl.program_id(0)
    S = src_tok_ref.shape[0]
    T = dec_tok_ref.shape[0]
    V, H = enc_proj_ref.shape

    # ---------------- Encoder: masked mean-pool -> ctx ----------------
    # One-hot "gather" with the length mask folded into the compare.
    # 0/1 values are exact in bf16; no //, %, or separate mask matmul.
    length = jnp.maximum(lens_ref[b], 1)                               # clamp >= 1
    v_iota_s = jax.lax.broadcasted_iota(jnp.int32, (S, V), 1)
    pos_s = jax.lax.broadcasted_iota(jnp.int32, (S, V), 0)
    onehot_src = ((src_tok_ref[...] == v_iota_s) & (pos_s < length)
                  ).astype(jnp.bfloat16)                               # (S, V)

    # Per-position source embeddings already projected through w_enc
    # (enc_proj pre-folded in the wrapper).  bf16 x bf16 -> f32 on the MXU.
    src_proj = jnp.dot(onehot_src, enc_proj_ref[...],
                       preferred_element_type=jnp.float32)             # (S, H)

    # Masked mean pool: sublane (XLU) reduce + scalar length divide,
    # off the MXU dependency chain.
    pooled = (jnp.sum(src_proj, axis=0, keepdims=True)
              / length.astype(jnp.float32))                            # (1, H)
    ctx = jnp.tanh(pooled + b_enc_ref[...])                            # (1, H) f32

    # ---------------- Decoder ----------------
    # Context contribution: broadcast ctx over the T target rows (sublane
    # broadcast, no selector matmul) and hit w_out once on the MXU.
    ctx_rows = jnp.broadcast_to(ctx.astype(jnp.bfloat16), (T, H))      # (T, H)
    ctx_logits = jnp.dot(ctx_rows, w_out_ref[...],
                         preferred_element_type=jnp.float32)           # (T, Vp)

    # Token contribution: one-hot gather straight into logit space via the
    # pre-folded table dec_tab = dec_embed @ w_out_p (independent of ctx path).
    v_iota_t = jax.lax.broadcasted_iota(jnp.int32, (T, V), 1)
    onehot_dec = (dec_tok_ref[...] == v_iota_t).astype(jnp.bfloat16)   # (T, V)
    dec_logits = jnp.dot(onehot_dec, dec_tab_ref[...],
                         preferred_element_type=jnp.float32)           # (T, Vp)

    out_ref[...] = dec_logits + ctx_logits + b_out_ref[...]


# -------------------------- one-time parameter prep ---------------------------

def prepare_fused_params(enc_embed, dec_embed, w_enc, b_enc, w_out, b_out):
    """Pad + pre-fold constant weight products ONCE (not on every forward)."""
    V = w_out.shape[1]
    V_PAD = pl.cdiv(V, LANE) * LANE
    w_out_p = jnp.pad(w_out, ((0, 0), (0, V_PAD - V)))
    b_out_p = jnp.pad(b_out, ((0, 0), (0, V_PAD - V)))
    return dict(
        enc_proj=(enc_embed @ w_enc).astype(jnp.bfloat16),     # (V, H)
        w_out_p=w_out_p.astype(jnp.bfloat16),                  # (H, V_PAD)
        dec_tab=(dec_embed @ w_out_p).astype(jnp.bfloat16),    # (V, V_PAD)
        b_enc=b_enc.astype(jnp.float32),                       # (1, H)
        b_out_p=b_out_p.astype(jnp.float32),                   # (1, V_PAD)
        vocab=V,
    )


# ------------------------------ JAX wrapper -----------------------------------

def fairseq_encoder_decoder_forward(src_tokens, src_lengths, prev_output_tokens,
                                    params):
    """Mirrors FairseqEncoderDecoderModel.forward:
       encoder_out = encoder(src_tokens, src_lengths)
       return decoder(prev_output_tokens, encoder_out)   -> (B, T, V) logits
    """
    B, S = src_tokens.shape
    _, T = prev_output_tokens.shape
    enc_proj = params["enc_proj"]
    w_out_p = params["w_out_p"]
    dec_tab = params["dec_tab"]
    b_enc = params["b_enc"]
    b_out_p = params["b_out_p"]
    V = params["vocab"]
    V_all, H = enc_proj.shape
    V_PAD = w_out_p.shape[1]

    # Wrapper-side layout plumbing: flat 2D token slabs, int32 lengths.
    src_flat = src_tokens.reshape(B * S, 1).astype(jnp.int32)
    dec_flat = prev_output_tokens.reshape(B * T, 1).astype(jnp.int32)
    lens = src_lengths.reshape(B).astype(jnp.int32)

    grid_spec = pltpu.PrefetchScalarGridSpec(
        num_scalar_prefetch=1,            # src_lengths -> SMEM
        grid=(B,),                        # one program per batch element
        in_specs=[
            pl.BlockSpec((S, 1), lambda b, lens: (b, 0)),          # src tokens
            pl.BlockSpec((T, 1), lambda b, lens: (b, 0)),          # dec tokens
            pl.BlockSpec((V_all, H), lambda b, lens: (0, 0)),      # enc_proj (resident)
            pl.BlockSpec((H, V_PAD), lambda b, lens: (0, 0)),      # w_out_p (resident)
            pl.BlockSpec((V_all, V_PAD), lambda b, lens: (0, 0)),  # dec_tab (resident)
            pl.BlockSpec((1, H), lambda b, lens: (0, 0)),          # b_enc
            pl.BlockSpec((1, V_PAD), lambda b, lens: (0, 0)),      # b_out_p
        ],
        out_specs=pl.BlockSpec((T, V_PAD), lambda b, lens: (b, 0)),
    )

    logits_pad = pl.pallas_call(
        _fused_encdec_kernel,
        out_shape=jax.ShapeDtypeStruct((B * T, V_PAD), jnp.float32),
        grid_spec=grid_spec,
        compiler_params=pltpu.CompilerParams(
            dimension_semantics=("parallel",)),   # shard batch across v7x cores
    )(lens, src_flat, dec_flat, enc_proj, w_out_p, dec_tab, b_enc, b_out_p)

    # Un-pad and restore (B, T, V) in the wrapper (free layout plumbing).
    return logits_pad[:, :V].reshape(B, T, V)


# ----------------------------------- main -------------------------------------

if __name__ == "__main__":
    B, S, T, H, V = 2, 8, 8, HIDDEN, VOCAB

    key = jax.random.PRNGKey(0)
    ks = jax.random.split(key, 8)

    src_tokens = jax.random.randint(ks[0], (B, S), 0, V, dtype=jnp.int32)
    src_lengths = jnp.array([S, S - 3], dtype=jnp.int32)
    prev_output_tokens = jax.random.randint(ks[1], (B, T), 0, V, dtype=jnp.int32)

    # Deterministic parameter init (synthetic, no checkpoint load).
    enc_embed = jax.random.normal(ks[2], (V, H), jnp.float32) * 0.02
    dec_embed = jax.random.normal(ks[3], (V, H), jnp.float32) * 0.02
    w_enc = jax.random.normal(ks[4], (H, H), jnp.float32) * 0.1
    b_enc = jnp.zeros((1, H), jnp.float32)
    w_out = jax.random.normal(ks[5], (H, V), jnp.float32) * 0.1
    b_out = jnp.zeros((1, V), jnp.float32)

    # One-time: pad + fold constant weight products, cast MXU operands to bf16.
    params = prepare_fused_params(enc_embed, dec_embed, w_enc, b_enc, w_out, b_out)

    out = fairseq_encoder_decoder_forward(
        src_tokens, src_lengths, prev_output_tokens, params)
    out = jax.block_until_ready(out)

    # Pure-JAX f32 reference of the original forward semantics.
    src_emb = enc_embed[src_tokens]
    dec_emb = dec_embed[prev_output_tokens]
    lens_f = src_lengths.astype(jnp.float32)[:, None]
    mask = (jnp.arange(S)[None, :] < src_lengths[:, None]).astype(jnp.float32) / lens_f
    pooled = jnp.sum(src_emb * mask[:, :, None], axis=1)
    ctx = jnp.tanh(pooled @ w_enc + b_enc)
    ref = (dec_emb + ctx[:, None, :]) @ w_out + b_out

    assert out.shape == (B, T, V)
    # bf16 tables on the MXU -> loosened tolerance vs the f32 reference.
    assert jnp.allclose(out, ref, rtol=2e-2, atol=2e-3), \
        float(jnp.max(jnp.abs(out - ref)))
    print("KERNEL_OK")
</pallas_src>

<mosaic_0001>
module attributes {stable_mosaic.version = 11 : i64} {
  func.func @_fused_encdec_kernel(%arg0: i32, %arg1: memref<2xi32, #tpu.memory_space<smem>>, %arg2: memref<8x1xi32, #tpu.memory_space<vmem>>, %arg3: memref<8x1xi32, #tpu.memory_space<vmem>>, %arg4: memref<64x32xbf16, #tpu.memory_space<vmem>>, %arg5: memref<32x128xbf16, #tpu.memory_space<vmem>>, %arg6: memref<64x128xbf16, #tpu.memory_space<vmem>>, %arg7: memref<1x32xf32, #tpu.memory_space<vmem>>, %arg8: memref<1x128xf32, #tpu.memory_space<vmem>>, %arg9: memref<8x128xf32, #tpu.memory_space<vmem>>) attributes {dimension_semantics = [#tpu.dimension_semantics<parallel>], iteration_bounds = array<i64: 2>, scalar_prefetch = 1 : i64, scratch_operands = 0 : i64, tpu.core_type = #tpu.core_type<tc>, window_params = [{transform_indices = @transform_0, window_bounds = array<i64: 8, 1>}, {transform_indices = @transform_1, window_bounds = array<i64: 8, 1>}, {pipeline_mode = #tpu.pipeline_mode<synchronous>, transform_indices = @transform_2, window_bounds = array<i64: 64, 32>}, {pipeline_mode = #tpu.pipeline_mode<synchronous>, transform_indices = @transform_3, window_bounds = array<i64: 32, 128>}, {pipeline_mode = #tpu.pipeline_mode<synchronous>, transform_indices = @transform_4, window_bounds = array<i64: 64, 128>}, {pipeline_mode = #tpu.pipeline_mode<synchronous>, transform_indices = @transform_5, window_bounds = array<i64: 1, 32>}, {pipeline_mode = #tpu.pipeline_mode<synchronous>, transform_indices = @transform_6, window_bounds = array<i64: 1, 128>}, {transform_indices = @transform_7, window_bounds = array<i64: 8, 128>}]} {
    %0 = arith.index_cast %arg0 : i32 to index
    %1 = memref.load %arg1[%0] : memref<2xi32, #tpu.memory_space<smem>>
    %c1_i32 = arith.constant 1 : i32
    %2 = arith.maxsi %1, %c1_i32 : i32
    %3 = tpu.iota {dimensions = array<i32: 1>} : vector<8x64xi32>
    %4 = tpu.iota {dimensions = array<i32: 0>} : vector<8x64xi32>
    %c0 = arith.constant 0 : index
    %c0_0 = arith.constant 0 : index
    %5 = vector.load %arg2[%c0, %c0_0] : memref<8x1xi32, #tpu.memory_space<vmem>>, vector<8x1xi32>
    %6 = vector.broadcast %5 : vector<8x1xi32> to vector<8x64xi32>
    %7 = arith.cmpi eq, %6, %3 : vector<8x64xi32>
    %8 = vector.broadcast %2 : i32 to vector<8x64xi32>
    %9 = arith.cmpi slt, %4, %8 : vector<8x64xi32>
    %10 = arith.andi %7, %9 : vector<8x64xi1>
    %11 = arith.extui %10 : vector<8x64xi1> to vector<8x64xi32>
    %12 = arith.sitofp %11 : vector<8x64xi32> to vector<8x64xf32>
    %13 = arith.truncf %12 : vector<8x64xf32> to vector<8x64xbf16>
    %c0_1 = arith.constant 0 : index
    %c0_2 = arith.constant 0 : index
    %14 = vector.load %arg4[%c0_1, %c0_2] : memref<64x32xbf16, #tpu.memory_space<vmem>>, vector<64x32xbf16>
    %cst = arith.constant dense<0.000000e+00> : vector<8x32xf32>
    %15 = tpu.matmul %13, %14, %cst {dimension_numbers = #tpu.dot_dimension_numbers<[1], [0], [0], [1], [0, 0, 1, 1], [], []>} : vector<8x64xbf16>, vector<64x32xbf16>, vector<8x32xf32> -> vector<8x32xf32>
    %cst_3 = arith.constant dense<0.000000e+00> : vector<32xf32>
    %16 = vector.multi_reduction <add>, %15, %cst_3 [0] : vector<8x32xf32> to vector<32xf32>
    %17 = vector.shape_cast %16 : vector<32xf32> to vector<1x32xf32>
    %18 = arith.sitofp %2 : i32 to f32
    %19 = vector.broadcast %18 : f32 to vector<1x32xf32>
    %20 = arith.divf %17, %19 : vector<1x32xf32>
    %c0_4 = arith.constant 0 : index
    %c0_5 = arith.constant 0 : index
    %21 = vector.load %arg7[%c0_4, %c0_5] : memref<1x32xf32, #tpu.memory_space<vmem>>, vector<1x32xf32>
    %22 = arith.addf %20, %21 : vector<1x32xf32>
    %23 = math.tanh %22 : vector<1x32xf32>
    %24 = arith.truncf %23 : vector<1x32xf32> to vector<1x32xbf16>
    %25 = vector.shape_cast %24 : vector<1x32xbf16> to vector<1x32xbf16>
    %26 = vector.broadcast %25 : vector<1x32xbf16> to vector<8x32xbf16>
    %c0_6 = arith.constant 0 : index
    %c0_7 = arith.constant 0 : index
    %27 = vector.load %arg5[%c0_6, %c0_7] : memref<32x128xbf16, #tpu.memory_space<vmem>>, vector<32x128xbf16>
    %cst_8 = arith.constant dense<0.000000e+00> : vector<8x128xf32>
    %28 = tpu.matmul %26, %27, %cst_8 {dimension_numbers = #tpu.dot_dimension_numbers<[1], [0], [0], [1], [0, 0, 1, 1], [], []>} : vector<8x32xbf16>, vector<32x128xbf16>, vector<8x128xf32> -> vector<8x128xf32>
    %29 = tpu.iota {dimensions = array<i32: 1>} : vector<8x64xi32>
    %c0_9 = arith.constant 0 : index
    %c0_10 = arith.constant 0 : index
    %30 = vector.load %arg3[%c0_9, %c0_10] : memref<8x1xi32, #tpu.memory_space<vmem>>, vector<8x1xi32>
    %31 = vector.broadcast %30 : vector<8x1xi32> to vector<8x64xi32>
    %32 = arith.cmpi eq, %31, %29 : vector<8x64xi32>
    %33 = arith.extui %32 : vector<8x64xi1> to vector<8x64xi32>
    %34 = arith.sitofp %33 : vector<8x64xi32> to vector<8x64xf32>
    %35 = arith.truncf %34 : vector<8x64xf32> to vector<8x64xbf16>
    %c0_11 = arith.constant 0 : index
    %c0_12 = arith.constant 0 : index
    %36 = vector.load %arg6[%c0_11, %c0_12] : memref<64x128xbf16, #tpu.memory_space<vmem>>, vector<64x128xbf16>
    %cst_13 = arith.constant dense<0.000000e+00> : vector<8x128xf32>
    %37 = tpu.matmul %35, %36, %cst_13 {dimension_numbers = #tpu.dot_dimension_numbers<[1], [0], [0], [1], [0, 0, 1, 1], [], []>} : vector<8x64xbf16>, vector<64x128xbf16>, vector<8x128xf32> -> vector<8x128xf32>
    %38 = arith.addf %37, %28 : vector<8x128xf32>
    %c0_14 = arith.constant 0 : index
    %c0_15 = arith.constant 0 : index
    %39 = vector.load %arg8[%c0_14, %c0_15] : memref<1x128xf32, #tpu.memory_space<vmem>>, vector<1x128xf32>
    %40 = vector.broadcast %39 : vector<1x128xf32> to vector<8x128xf32>
    %41 = arith.addf %38, %40 : vector<8x128xf32>
    %c0_16 = arith.constant 0 : index
    %c0_17 = arith.constant 0 : index
    %42 = vector.load %arg9[%c0_16, %c0_17] : memref<8x128xf32, #tpu.memory_space<vmem>>, vector<8x128xf32>
    tpu.vector_store %arg9[%c0_16, %c0_17], %41 {strides = array<i32>} : memref<8x128xf32, #tpu.memory_space<vmem>>, vector<8x128xf32>,
    return
  }
  func.func @transform_0(%arg0: i32, %arg1: memref<2xi32, #tpu.memory_space<smem>>) -> (i32, i32) {
    %c0_i32 = arith.constant 0 : i32
    %c0_i32_0 = arith.constant 0 : i32
    return %arg0, %c0_i32 : i32, i32
  }
  func.func @transform_1(%arg0: i32, %arg1: memref<2xi32, #tpu.memory_space<smem>>) -> (i32, i32) {
    %c0_i32 = arith.constant 0 : i32
    %c0_i32_0 = arith.constant 0 : i32
    return %arg0, %c0_i32 : i32, i32
  }
  func.func @transform_2(%arg0: i32, %arg1: memref<2xi32, #tpu.memory_space<smem>>) -> (i32, i32) {
    %c0_i32 = arith.constant 0 : i32
    %c0_i32_0 = arith.constant 0 : i32
    %c0_i32_1 = arith.constant 0 : i32
    return %c0_i32, %c0_i32_0 : i32, i32
  }
  func.func @transform_3(%arg0: i32, %arg1: memref<2xi32, #tpu.memory_space<smem>>) -> (i32, i32) {
    %c0_i32 = arith.constant 0 : i32
    %c0_i32_0 = arith.constant 0 : i32
    %c0_i32_1 = arith.constant 0 : i32
    return %c0_i32, %c0_i32_0 : i32, i32
  }
  func.func @transform_4(%arg0: i32, %arg1: memref<2xi32, #tpu.memory_space<smem>>) -> (i32, i32) {
    %c0_i32 = arith.constant 0 : i32
    %c0_i32_0 = arith.constant 0 : i32
    %c0_i32_1 = arith.constant 0 : i32
    return %c0_i32, %c0_i32_0 : i32, i32
  }
  func.func @transform_5(%arg0: i32, %arg1: memref<2xi32, #tpu.memory_space<smem>>) -> (i32, i32) {
    %c0_i32 = arith.constant 0 : i32
    %c0_i32_0 = arith.constant 0 : i32
    %c0_i32_1 = arith.constant 0 : i32
    return %c0_i32, %c0_i32_0 : i32, i32
  }
  func.func @transform_6(%arg0: i32, %arg1: memref<2xi32, #tpu.memory_space<smem>>) -> (i32, i32) {
    %c0_i32 = arith.constant 0 : i32
    %c0_i32_0 = arith.constant 0 : i32
    %c0_i32_1 = arith.constant 0 : i32
    return %c0_i32, %c0_i32_0 : i32, i32
  }
  func.func @transform_7(%arg0: i32, %arg1: memref<2xi32, #tpu.memory_space<smem>>) -> (i32, i32) {
    %c0_i32 = arith.constant 0 : i32
    %c0_i32_0 = arith.constant 0 : i32
    return %arg0, %c0_i32 : i32, i32
  }
}

</mosaic_0001>

<bundles_post_ra>
// kernel: tpu_custom_call.1
= control target key start
LH: loop header
LB: loop body
LE: loop exit
PB: predicated region body
PF: predicated region fallthrough
CT: control target
= control target key end

     0   :  { %s1072_s0 = inlined_call_operand.vmem [shape: s32[2], index: 0, kind: input, shape index: {}]   ;;  %s1073_s1 = inlined_call_operand.vmem [shape: s32[16,1], index: 1, kind: input, shape index: {}]   ;;  %s1074_s2 = inlined_call_operand.vmem [shape: s32[16,1], index: 2, kind: input, shape index: {}]   ;;  %s1075_s3 = inlined_call_operand.vmem [shape: bf16[64,32], index: 3, kind: input, shape index: {}]   ;;  %s1076_s4 = inlined_call_operand.vmem [shape: bf16[32,128], index: 4, kind: input, shape index: {}]   ;;  %s1077_s5 = inlined_call_operand.vmem [shape: bf16[64,128], index: 5, kind: input, shape index: {}]   ;;  %s1078_s6 = inlined_call_operand.vmem [shape: f32[1,32], index: 6, kind: input, shape index: {}]   ;;  %s1079_s7 = inlined_call_operand.vmem [shape: f32[1,128], index: 7, kind: input, shape index: {}]   ;;  %s1080_s8 = inlined_call_operand.hbm [shape: f32[16,128], index: 8, kind: output, shape index: {}]  }
   0x1   :  { %s13_s29 = sshll.u32 %s1072_s0, 4  ;;  %s14_s29 = int_to_ptr.vmem [resolvable:$true] %s13_s29 }
   0x2   :  { %s782_s30 = scalar_lea.vmem %s14_s29, 16  ;;  %p787_p1 = scmp.lt.s32.totalorder %s14_s29, %s14_s29 }
   0x3   :  { %p783_p0 = scmp.ne.s32.totalorder %s14_s29, %s782_s30  ;;  %p788_p2 = scmp.lt.s32.totalorder %s782_s30, %s782_s30 }
   0x5   :  { %p789_p3 = por %p788_p2, %p787_p1 }
   0x7   :  { %p790_p4 = pnand %p789_p3, %p783_p0 }
   0x9   :  { %793 = shalt.err (!%p790_p4)  }
   0xa   :  { %s858_s9 = smov [#allocation3]  }
   0xb   :  { %16 = dma.vmem_to_smem %s14_s29, 16, %s858_s9, [#allocation2] }
   0xc   :  { %836 = dma.done.wait [#allocation2], 16 }
   0xd   :  { %837 = vsyncadd [#allocation2], 4294967280 }
   0xe   :  { %18 = sfence }
   0xf   :  { %19 = vsyncpa [#allocation5], 0 }
  0x10   :  { %21 = vsyncpa [#allocation5 + $0x1], 0  ;;  %s911_s10 = smov 0   ;;  %s913_s11 = smov 0  }
  0x11   :  { %s915_s0 = smov 0   ;;  %s917_s12 = smov 0  }
  0x12 LB: > { %s932_s13 = sadd.s32 4294967295, %s856_s12   ;;  %s652_s14 = sadd.s32 4294967294, %s856_s12   ;;  %s856_s12 = sphi %s917_s12, %s1086_s12   ;;  %s852_s0 = sphi %s915_s0, %s1085_s0   ;;  %s848_s11 = sphi %s913_s11, %s1084_s11   ;;  %s844_s10 = sphi %s911_s10, %s1083_s10  }
  0x13   : > { %s936_s15 = sadd.s32 1, %s856_s12   ;;  %s191_s16 = sadd.s32 1, %s852_s0 }
  0x14   : > { %s188_s17 = ssub.s32 %s856_s12, %s936_s15  ;;  %p201_p5 = scmp.ne.s32.totalorder %s852_s0, %s848_s11 }
  0x15   : > { %p189_p6 = scmp.eq.s32.totalorder %s188_s17, 0  ;;  %p202_p7 = scmp.eq.s32.totalorder %s932_s13, 1 }
  0x16   : > { %p207_p8 = scmp.ne.s32.totalorder %s848_s11, %s844_s10  ;;  %p208_p9 = scmp.eq.s32.totalorder %s652_s14, 1 }
  0x17   : > { %s947_s18 = scalar_select %p189_p6, %s852_s0, %s191_s16  }
  0x18   : > { %p949_p10 = por %p202_p7, %p201_p5  ;;  %p953_p11 = por %p208_p9, %p207_p8 }
  0x19   : > { %p655_p12 = scmp.ge.s32.totalorder %s856_s12, 1  ;;  %p255_p13 = scmp.lt.s32.totalorder %s856_s12, 3 }
  0x1b   : > { %p256_p0 = pnand %p655_p12, %p255_p13 }
  0x1c   : > { %p290_p1 = scmp.lt.s32.totalorder (!%p256_p0), %s932_s13, 1  ;;  %s287_s25 = sand.u32 (!%p256_p0), 1, %s848_s11  }
  0x1d   : > { %259 = sbr.rel (%p256_p0) target bundleno = 625 (0x271), region = 48  ;;  %s568_s21 = scalar_lea.sflag (!%p256_p0), [#allocation5], %s287_s25 }
  0x1e   : > { %s862_s22 = smov (!%p256_p0), [#allocation4]  }
  0x22   : > { %v768_v0 = vld [vmem:[%s1075_s3 + $0x18] sm:$0xff]   ;;  %v859_v1 = vmov 0   ;;  %v860_v2 = vmov 0.0   ;;  %s291_s23 = scalar_select %p290_p1, %s932_s13, 1  ;;  %v769_v3 = vld [vmem:[%s1075_s3 + $0x10] sm:$0xff]   ;;  %v770_v5 = vld [vmem:[%s1075_s3 + $0x8] sm:$0xff]   ;;  %v302_v8 = vlaneseq }
  0x23   : > { %767 = vset.pattern.permute.xlu0 %v859_v1  ;;  %692 = vmatprep.subr.bf16.mxu0 %v860_v2  ;;  %vm861_vm0 = vmmov 0   ;;  %v771_v7 = vld [vmem:[%s1075_s3] sm:$0xff]   ;;  %vm349_vm4 = vcmask 523264   ;;  %v772_v15 = vld [vmem:[%s1076_s4 + $0x8] sm:$0xff]   ;;  %vm393_vm5 = vcmask 261120   ;;  %v774_v37 = vld [vmem:[%s1077_s5 + $0x18] sm:$0xff]  }
  0x24   : > { %693 = vmatpush3.bf16.msra.mxu0 %v768_v0  ;;  %704 = vmatprep.subr.bf16.mxu1 %v860_v2  ;;  %s657_s26 = sshll.u32 %s291_s23, 3  ;;  %s299_s23 = sld [smem:[#allocation3 + %s932_s13]]  ;;  %v305_v9 = vshrl.u32 %v302_v8, 7  ;;  %v303_v11 = vand.u32 127, %v302_v8  ;;  %v773_v16 = vld [vmem:[%s1076_s4] sm:$0xff]   ;;  %v775_v39 = vld [vmem:[%s1077_s5 + $0x10] sm:$0xff]  }
  0x25   : > { %694 = vmatprep.subr.bf16.mxu0 %v860_v2  ;;  %s293_s29 = scalar_lea.vmem %s1073_s1, %s657_s26  ;;  %s297_s14 = scalar_lea.vmem %s1074_s2, %s657_s26  ;;  %700 = vmatprep.mubr.msk.bf16.mxu0 %vm861_vm0, %v860_v2  ;;  %v405_v30 = vld [vmem:[%s1078_s6] sm:$0x1]  ;;  %v776_v41 = vld [vmem:[%s1077_s5 + $0x8] sm:$0xff]  }
  0x26   : > { %v306_v4 = vld [vmem:[%s293_s29] sm:$0xff]  ;;  %708 = vmatprep.mubr.msk.bf16.mxu1 %vm861_vm0, %v860_v2  ;;  %705 = vmatpush3.bf16.msra.mxu1 %v772_v15  ;;  %v414_v34 = vsub.s32 0, %v305_v9  ;;  %s656_s26 = sshll.u32 %s287_s25, 3  ;;  %s676_s29 = sshll.u32 %s932_s13, 7 }
  0x27   : > { %308 = vperm.xlu0 %767, %v306_v4   ;;  %v475_v6 = vld [vmem:[%s297_s14] sm:$0xff]  ;;  %706 = vmatprep.subr.bf16.mxu1 %v860_v2  ;;  %s289_s30 = scalar_lea.vmem [#allocation4], %s656_s26  ;;  %s1031_s17 = scalar_lea.hbm %s1080_s8, %s676_s29 }
  0x28   : > { %695 = vmatpush3.bf16.msra.mxu0 %v769_v3  ;;  %v777_v42 = vld [vmem:[%s1077_s5] sm:$0xff]   ;;  %s581_s9 = sshll.u32 %s289_s30, 4  ;;  %s1033_s9 = int_to_ptr.vmem [resolvable:$true] %s581_s9 }
  0x29   : > { %696 = vmatprep.subr.bf16.mxu0 %v860_v2  ;;  %v674_v50 = vld [vmem:[%s1079_s7] ss:$0 sm:$0xff]  ;;  %s794_s13 = scalar_lea.vmem %s1033_s9, 128 }
  0x2a   : > { %p300_p2 = scmp.gt.s32.totalorder %s299_s23, 1  ;;  %707 = vmatpush3.bf16.msra.mxu1 %v773_v16  ;;  %p795_p3 = scmp.ne.s32.totalorder %s1033_s9, %s794_s13 }
  0x2b   : > { %477 = vperm.xlu0 %767, %v475_v6   ;;  %712 = vmatprep.subr.bf16.mxu1 %v860_v2 }
  0x2c   : > { %697 = vmatpush3.bf16.msra.mxu0 %v770_v5  ;;  %s1088_s23 = smov (!%p300_p2, %s299_s23), 1  ;;  %p796_p4 = pnand %p795_p3, %p949_p10 }
  0x2d   : > { %698 = vmatprep.subr.bf16.mxu0 %v860_v2  ;;  %v311_v10 = vstv %s1088_s23  ;;  %s401_s28 = scvt.s32.f32 %s1088_s23  ;;  %s798_s23 = sshll.u32 %s862_s22, 4  ;;  %s799_s23 = int_to_ptr.vmem [resolvable:$false] %s798_s23 }
  0x2e   : > { %vm312_vm1 = vcmp.lt.s32.totalorder %v305_v9, %v311_v10  ;;  %p797_p5 = pneg %p796_p4  ;;  %s800_s24 = scalar_lea.vmem %s799_s23, 256 }
  0x2f   : > { %v402_v17 = vstv %s401_s28  ;;  %p801_p6 = scmp.lt.s32.totalorder %s1033_s9, %s799_s23  ;;  %p802_p7 = scmp.lt.s32.totalorder %s800_s24, %s794_s13 }
  0x30   : > { %699 = vmatpush3.bf16.msra.mxu0 %v771_v7  ;;  %778 = vrcp.f32 %v402_v17 }
  0x31   : > { %p803_p8 = por %p802_p7, %p801_p6 }
  0x33   : > { %p804_p9 = pnand %p803_p8, %p797_p5 }
  0x3d   : > { %v779_v28 = vpop.eup %778 }
  0xa2   : > { %v309_v12 = vpop.permute.xlu0 %308 }
  0xa3   : > { %vm310_vm2 = vcmp.eq.s32.totalorder %v309_v12, %v303_v11 }
  0xa4   : > { %vm313_vm3 = vmand %vm310_vm2, %vm312_vm1 }
  0xa5   : > { %v659_v13 = vsel %vm313_vm3, 1.0, %v860_v2 }
  0xa6   : > { %v316_v14 = vpack.c.bf16 %v659_v13, %v659_v13  ;;  %v478_v40 = vpop.permute.xlu0 %477 }
  0xa7   : > { %vm479_vm6 = vcmp.eq.s32.totalorder %v478_v40, %v303_v11 }
  0xa8   : > { %701 = vmatmul.mubr.msk.bf16.vlgmr.msra.gmra.mxu0 %vm349_vm4, %v316_v14  ;;  %v668_v43 = vsel %vm479_vm6, 1.0, %v860_v2 }
  0xa9   : > { %v482_v44 = vpack.c.bf16 %v668_v43, %v668_v43 }
 0x168   : > { %v387_v18 = vpop.f32.mrf.mxu0 }
 0x169   : > { %v394_v19 = vsel %vm393_vm5, %v387_v18, 0.0 }
 0x16a   : > { %v395_v20 = vrot.slane %v394_v19, 4  ;;  %v702_v21 = vpop.f32.mrf.mxu0 }
 0x16c   : > { %v396_v22 = vadd.f32 %v395_v20, %v394_v19  ;;  %v390_v23 = vpop.f32.mrf.mxu0 }
 0x16e   : > { %v397_v24 = vrot.slane %v396_v22, 2  ;;  %v703_v25 = vpop.f32.mrf.mxu0 }
 0x170   : > { %v398_v26 = vadd.f32 %v397_v24, %v396_v22 }
 0x172   : > { %v399_v27 = vrot.slane %v398_v26, 1 }
 0x174   : > { %v400_v29 = vadd.f32 %v399_v27, %v398_v26 }
 0x176   : > { %v404_v31 = vmul.f32 %v779_v28, %v400_v29 }
 0x178   : > { %v406_v32 = vadd.f32 %v405_v30, %v404_v31 }
 0x17a   : > { %780 = vtanh.f32 %v406_v32 }
 0x187   : > { %v781_v33 = vpop.eup %780 }
 0x188   : > { %v408_v35 = vpack.c.bf16 %v781_v33, %v781_v33 }
 0x18a   : > { %v410_v36 = vpack.i.b16 %v408_v35, %v408_v35 }
 0x18c   : > { %v415_v38 = vrot.slane %v410_v36, %v414_v34 }
 0x18e   : > { %709 = vmatmul.mubr.msk.bf16.vlgmr.msra.gmra.mxu1 %vm393_vm5, %v415_v38 }
 0x18f   : > { %713 = vmatpush3.bf16.msra.mxu1 %v774_v37  ;;  %720 = vmatprep.mubr.msk.bf16.mxu1 %vm861_vm0, %v860_v2 }
 0x190   : > { %714 = vmatprep.subr.bf16.mxu1 %v860_v2 }
 0x193   : > { %715 = vmatpush3.bf16.msra.mxu1 %v775_v39 }
 0x194   : > { %716 = vmatprep.subr.bf16.mxu1 %v860_v2 }
 0x197   : > { %717 = vmatpush3.bf16.msra.mxu1 %v776_v41 }
 0x198   : > { %718 = vmatprep.subr.bf16.mxu1 %v860_v2 }
 0x19b   : > { %719 = vmatpush3.bf16.msra.mxu1 %v777_v42 }
 0x19e   : > { %721 = vmatmul.mubr.msk.bf16.vlgmr.msra.gmra.mxu1 %vm349_vm4, %v482_v44 }
 0x24e   : > { %v469_v45 = vpop.f32.mrf.mxu1 }
 0x250   : > { %v710_v46 = vpop.f32.mrf.mxu1 }
 0x252   : > { %v472_v47 = vpop.f32.mrf.mxu1 }
 0x254   : > { %v711_v48 = vpop.f32.mrf.mxu1 }
 0x25e   : > { %v552_v49 = vpop.f32.mrf.mxu1 }
 0x25f   : > { %v553_v51 = vadd.f32 %v552_v49, %v469_v45 }
 0x260   : > { %v722_v52 = vpop.f32.mrf.mxu1 }
 0x261   : > { %v565_v53 = vadd.f32 %v674_v50, %v553_v51 }
 0x262   : > { %v555_v54 = vpop.f32.mrf.mxu1 }
 0x263   : > { %566 = vst [vmem:[%s289_s30] sm:$0xff] %v565_v53 }
 0x264   : > { %v723_v55 = vpop.f32.mrf.mxu1 }
 0x265   : > { %807 = shalt.err (!%p804_p9)
}
 0x266   : > { %s808_s26 = scalar_lea.hbm %s1031_s17, 128  ;;  %s812_s28 = scalar_lea.hbm %s1080_s8, 256 }
 0x267   : > { %p809_p12 = scmp.ne.s32.totalorder %s1031_s17, %s808_s26  ;;  %p813_p1 = scmp.lt.s32.totalorder %s1031_s17, %s1080_s8 }
 0x268   : > { %p814_p2 = scmp.lt.s32.totalorder %s812_s28, %s808_s26 }
 0x269   : > { %p810_p13 = pnand %p809_p12, %p949_p10 }
 0x26a   : > { %p815_p3 = por %p814_p2, %p813_p1 }
 0x26b   : > { %p811_p0 = pneg %p810_p13 }
 0x26d   : > { %p816_p4 = pnand %p815_p3, %p811_p0 }
 0x26f   : > { %819 = shalt.err (!%p816_p4)
}
 0x270   : > { %724 = dma.vmem_to_hbm [thread:$0]  (%p949_p10), %s1033_s9, 128, %s1031_s17, %s568_s21  }
 0x271 PF: > { %p730_p5 = scmp.ge.s32.totalorder %s856_s12, 2  ;;  %s593_s14 = sand.u32 1, %s844_s10  }
 0x272   : > { %s594_s16 = scalar_lea.sflag [#allocation5], %s593_s14 }
 0x273   : > { %p727_p6 = pnand %p730_p5, %p953_p11 }
 0x275   : > { %p728_p7 = pneg %p727_p6 }
 0x277   : > { %839 = dma.done.wait (%p728_p7), %s594_s16, 128  }
 0x278   : > { %841 = vsyncadd (%p728_p7), %s594_s16, 4294967168  ;;  %p24_p8 = scmp.ge.s32.totalorder %s936_s15, 4   ;;  %s1083_s10 = smov %s848_s11 }
 0x279   : > { %s1084_s11 = smov %s852_s0  ;;  %s1085_s0 = smov %s947_s18 }
 0x27a   : > { %s1086_s12 = smov %s936_s15  ;;  %26 = sbr.rel (!%p24_p8) target bundleno = 18 (0x12), region = 86 }
 0x27f   :  { %599 = vsyncpa [#allocation5], 1 }
 0x280   :  { %601 = vsyncpa [#allocation5 + $0x1], 1 }

</bundles_post_ra>
